<compile_context>
chip_gen: v6e
topology: v6e:2x2x1
jax: 0.10.0
libtpu: 0.0.40
codegen_flags: <defaults>
</compile_context>

<pallas_src>
import functools
import math

import jax
import jax.numpy as jnp
from jax.experimental import pallas as pl
from jax.experimental.pallas import tpu as pltpu


def _round_up(x, m):
    return ((x + m - 1) // m) * m


# ---------------------------------------------------------------------------
# Kernel 1: query projection (bf16 MXU) + fused BatchNorm batch statistics.
# grid = (col tiles, row tiles); stats blocks stay resident across the inner
# row axis and accumulate per-column sum / sum-of-squares in f32.
# q is written back in bf16.
# ---------------------------------------------------------------------------
def _qproj_kernel(x_ref, w_ref, q_ref, sum_ref, sq_ref):
    i = pl.program_id(1)                       # row-tile index (reduction axis)
    q = jnp.dot(x_ref[...], w_ref[...], preferred_element_type=jnp.float32)
    q_ref[...] = q.astype(q_ref.dtype)         # bf16 writeback

    @pl.when(i == 0)
    def _():
        sum_ref[...] = jnp.zeros_like(sum_ref)
        sq_ref[...] = jnp.zeros_like(sq_ref)

    sum_ref[...] += jnp.sum(q, axis=0, keepdims=True)
    sq_ref[...] += jnp.sum(q * q, axis=0, keepdims=True)


# ---------------------------------------------------------------------------
# Kernel 2: BN affine + product-key dots + fused per-(p, head) top-k.
# grid = (2, heads, row tiles) -- rows innermost, so the (p, h) key table is
# fetched once and stays resident.  Emits (1, 1, row_block, topk) score and
# index blocks (head-major layout, no transposes downstream).
# ---------------------------------------------------------------------------
def _dots_topk_kernel(q_ref, k_ref, mean_ref, inv_ref, s_ref, i_ref,
                      *, topk, num_keys):
    # BN affine on the VPU (q stored bf16, upcast for the affine)
    qn = (q_ref[...].astype(jnp.float32) - mean_ref[...]) * inv_ref[...]
    d = jax.lax.dot_general(
        qn.astype(jnp.bfloat16), k_ref[0, 0],          # (rb, d2) x (nk, d2)^T
        dimension_numbers=(((1,), (1,)), ((), ())),
        preferred_element_type=jnp.float32)            # (rb, num_keys) f32

    rb = d.shape[0]
    col = jax.lax.broadcasted_iota(jnp.int32, d.shape, 1)
    kcol = jax.lax.broadcasted_iota(jnp.int32, (rb, topk), 1)

    work = d
    out_s = jnp.zeros((rb, topk), jnp.float32)
    out_i = jnp.zeros((rb, topk), jnp.int32)
    # Iterative top-k: lane-max + lowest-index-of-max (matches lax.top_k tie
    # break) + mask.  XLU reduces run in their own slot; topk is small.
    for j in range(topk):
        m = jnp.max(work, axis=-1, keepdims=True)                      # (rb, 1)
        amin = jnp.min(jnp.where(work == m, col, num_keys),
                       axis=-1, keepdims=True)                         # (rb, 1)
        out_s = jnp.where(kcol == j, m, out_s)
        out_i = jnp.where(kcol == j, amin, out_i)
        work = jnp.where(col == amin, -jnp.inf, work)

    s_ref[0, 0] = out_s
    i_ref[0, 0] = out_i


# ---------------------------------------------------------------------------
# Kernel 3: weighted EmbeddingBag('sum') over the selected value rows.
# Value indices arrive flattened (head-major) via scalar prefetch (SMEM);
# the bf16 value table stays in HBM (memory_space=pl.ANY).  Per head, all
# row DMAs for the next head are issued (one semaphore per buffer slot)
# before waiting on the current head, and the current head's VPU
# broadcast-multiply + reduce runs while the next head's rows land.
# ---------------------------------------------------------------------------
def _bag_kernel(idx_ref, attn_ref, values_hbm, o_ref, gathered, sems,
                *, tb, heads, topk, dim, head_stride):
    i = pl.program_id(0)
    per_head = tb * topk

    def issue(h, slot):
        b0 = h * head_stride + i * per_head            # flat SMEM offset, no div/mod
        def body(jj, c):
            row = idx_ref[b0 + jj]
            pltpu.make_async_copy(values_hbm.at[row], gathered.at[slot, jj],
                                  sems.at[slot]).start()
            return c
        jax.lax.fori_loop(0, per_head, body, 0)

    def wait_all(slot):
        def body(jj, c):
            # wait only needs a matching row shape; src index is irrelevant
            pltpu.make_async_copy(values_hbm.at[0], gathered.at[slot, jj],
                                  sems.at[slot]).wait()
            return c
        jax.lax.fori_loop(0, per_head, body, 0)

    issue(0, 0)
    acc = jnp.zeros((tb, dim), jnp.float32)
    for h in range(heads):                              # static unroll over heads
        slot = h & 1
        if h + 1 < heads:
            issue(h + 1, 1 - slot)                      # enqueue next head's gather
        wait_all(slot)                                  # current head's rows landed
        g = gathered[slot].reshape(tb, topk, dim).astype(jnp.float32)
        w = attn_ref[h]                                 # (tb, topk) f32
        acc = acc + jnp.sum(w[:, :, None] * g, axis=1)  # VPU mul + sublane reduce
    o_ref[...] = acc


# ---------------------------------------------------------------------------
# Forward pass
# ---------------------------------------------------------------------------
def pkm_forward(x, params, *, heads, num_keys, topk, dim_head):
    b, t, dim = x.shape
    bt = b * t
    d2 = dim_head // 2
    dim_query = heads * dim_head

    # lane-density requirements of the chosen BlockSpecs
    assert d2 % 128 == 0, "dim_head // 2 must be a multiple of 128"
    assert num_keys % 128 == 0, "num_keys must be a multiple of 128"

    wq = params["wq"].astype(jnp.bfloat16)                         # (dim, dim_query)
    k_r = jnp.transpose(params["keys"], (2, 0, 1, 3)).astype(jnp.bfloat16)
    values_bf = params["values"].astype(jnp.bfloat16)              # bf16 gather table

    # 256-row tiles (good HBM utilization on v5e/v6e/v7x); small inputs shrink.
    row_block = min(256, _round_up(bt, 8))
    btp = _round_up(bt, row_block)
    n_rows = btp // row_block

    x_pad = jnp.pad(x.reshape(bt, dim), ((0, btp - bt), (0, 0))).astype(jnp.bfloat16)

    vmem_limit = 48 * 1024 * 1024        # headroom even on v7x's 64 MiB VMEM

    # ---- K1: query projection + BN batch statistics -------------------------
    if dim_query % 512 == 0:
        tn = 512                          # n_cols >= 2 keeps both v7x TCs busy
    elif dim_query % 256 == 0:
        tn = 256
    elif dim_query % 128 == 0:
        tn = 128
    else:
        tn = dim_query
    n_cols = dim_query // tn

    q, qsum, qsq = pl.pallas_call(
        _qproj_kernel,
        grid=(n_cols, n_rows),
        in_specs=[
            pl.BlockSpec((row_block, dim), lambda j, i: (i, 0)),
            pl.BlockSpec((dim, tn), lambda j, i: (0, j)),
        ],
        out_specs=[
            pl.BlockSpec((row_block, tn), lambda j, i: (i, j)),
            pl.BlockSpec((1, tn), lambda j, i: (0, j)),
            pl.BlockSpec((1, tn), lambda j, i: (0, j)),
        ],
        out_shape=[
            jax.ShapeDtypeStruct((btp, dim_query), jnp.bfloat16),
            jax.ShapeDtypeStruct((1, dim_query), jnp.float32),
            jax.ShapeDtypeStruct((1, dim_query), jnp.float32),
        ],
        compiler_params=pltpu.CompilerParams(
            dimension_semantics=("parallel", "arbitrary"),
            vmem_limit_bytes=vmem_limit),
    )(x_pad, wq)

    # BN finalize (training-mode batch stats, weight=1, bias=0).  Zero-padded
    # rows contribute zero to both sums, so dividing by the true bt is exact.
    mean = qsum[0] / bt
    var = qsq[0] / bt - mean * mean
    inv_std = 1.0 / jnp.sqrt(var + 1e-5)
    mean2 = mean.reshape(1, dim_query)
    inv2 = inv_std.reshape(1, dim_query)

    # ---- K2: BN affine + product-key dots + fused per-(p, h) top-k ----------
    scores_ph, idx_ph = pl.pallas_call(
        functools.partial(_dots_topk_kernel, topk=topk, num_keys=num_keys),
        grid=(2, heads, n_rows),                       # rows innermost: keys resident
        in_specs=[
            pl.BlockSpec((row_block, d2), lambda p, h, i: (i, p * heads + h)),
            pl.BlockSpec((1, 1, num_keys, d2), lambda p, h, i: (p, h, 0, 0)),
            pl.BlockSpec((1, d2), lambda p, h, i: (0, p * heads + h)),
            pl.BlockSpec((1, d2), lambda p, h, i: (0, p * heads + h)),
        ],
        out_specs=[
            pl.BlockSpec((1, 1, row_block, topk), lambda p, h, i: (p, h, i, 0)),
            pl.BlockSpec((1, 1, row_block, topk), lambda p, h, i: (p, h, i, 0)),
        ],
        out_shape=[
            jax.ShapeDtypeStruct((2, heads, btp, topk), jnp.float32),
            jax.ShapeDtypeStruct((2, heads, btp, topk), jnp.int32),
        ],
        compiler_params=pltpu.CompilerParams(
            dimension_semantics=("parallel", "parallel", "arbitrary"),
            vmem_limit_bytes=vmem_limit),
    )(q, k_r, mean2, inv2)

    # ---- product-key recombination + 2nd-stage top-k (tiny, plain JAX) ------
    # TODO(synk): the combined topk^2 top-k / sort has no Mosaic lowering; kept in JAX.
    s0, s1 = scores_ph[0], scores_ph[1]                    # (heads, btp, topk)
    i0, i1 = idx_ph[0], idx_ph[1]
    all_scores = (s0[..., :, None] + s1[..., None, :]).reshape(heads, btp, topk * topk)
    all_indices = (i0[..., :, None] * num_keys + i1[..., None, :]).reshape(
        heads, btp, topk * topk)
    final_scores, final_pos = jax.lax.top_k(all_scores, topk)   # (heads, btp, topk)
    value_indices = jnp.take_along_axis(all_indices, final_pos, axis=-1)
    attn = jax.nn.softmax(final_scores, axis=-1)                # exact softmax
    # head-major flat indices -> SMEM scalar prefetch (1-D, no 2-D SMEM padding)
    vi_flat = value_indices.reshape(-1).astype(jnp.int32)

    # ---- K3: weighted gather-sum (EmbeddingBag 'sum') ------------------------
    kernel = functools.partial(_bag_kernel, tb=row_block, heads=heads,
                               topk=topk, dim=dim, head_stride=btp * topk)
    out = pl.pallas_call(
        kernel,
        grid_spec=pltpu.PrefetchScalarGridSpec(
            num_scalar_prefetch=1,
            grid=(n_rows,),
            in_specs=[
                pl.BlockSpec((heads, row_block, topk), lambda i, idx: (0, i, 0)),
                pl.BlockSpec(memory_space=pl.ANY),         # bf16 value table in HBM
            ],
            out_specs=pl.BlockSpec((row_block, dim), lambda i, idx: (i, 0)),
            scratch_shapes=[
                pltpu.VMEM((2, row_block * topk, dim), jnp.bfloat16),  # per-head slabs
                pltpu.SemaphoreType.DMA((2,)),                          # one per slot
            ],
        ),
        out_shape=jax.ShapeDtypeStruct((btp, dim), jnp.float32),
        compiler_params=pltpu.CompilerParams(
            dimension_semantics=("parallel",),
            vmem_limit_bytes=vmem_limit),
    )(vi_flat, attn, values_bf)

    return out[:bt].reshape(b, t, dim)


# ---------------------------------------------------------------------------
# Pure-JAX reference (mirrors the PyTorch forward with the same bf16
# quantization points as the kernels so the comparison is meaningful).
# ---------------------------------------------------------------------------
def pkm_reference(x, params, *, heads, num_keys, topk, dim_head):
    b, t, dim = x.shape
    bt = b * t
    d2 = dim_head // 2
    q = jnp.dot(x.reshape(bt, dim).astype(jnp.bfloat16),
                params["wq"].astype(jnp.bfloat16),
                preferred_element_type=jnp.float32)
    mean = jnp.sum(q, axis=0) / bt
    var = jnp.sum(q * q, axis=0) / bt - mean * mean
    inv_std = 1.0 / jnp.sqrt(var + 1e-5)
    qb = q.astype(jnp.bfloat16).astype(jnp.float32)       # mirror bf16 q storage
    qn = (qb - mean) * inv_std
    qr = qn.reshape(bt, 2, heads, d2)
    dots = jnp.einsum('bphd,hnpd->bhpn', qr.astype(jnp.bfloat16),
                      params["keys"].astype(jnp.bfloat16),
                      preferred_element_type=jnp.float32)
    scores, indices = jax.lax.top_k(dots, topk)
    s0, s1 = scores[:, :, 0], scores[:, :, 1]
    i0, i1 = indices[:, :, 0], indices[:, :, 1]
    all_scores = (s0[..., :, None] + s1[..., None, :]).reshape(bt, heads, topk * topk)
    all_indices = (i0[..., :, None] * num_keys + i1[..., None, :]).reshape(
        bt, heads, topk * topk)
    final_scores, final_pos = jax.lax.top_k(all_scores, topk)
    value_indices = jnp.take_along_axis(all_indices, final_pos, axis=-1)
    attn = jax.nn.softmax(final_scores, axis=-1)
    w = attn.reshape(bt, heads * topk)
    vi = value_indices.reshape(bt, heads * topk)
    gathered = params["values"].astype(jnp.bfloat16)[vi].astype(jnp.float32)
    out = jnp.einsum('bk,bkd->bd', w, gathered)
    return out.reshape(b, t, dim)


if __name__ == "__main__":
    # small but lane-aligned sizes (num_keys, dim_head//2 multiples of 128)
    B, T, DIM = 2, 8, 128
    HEADS, NUM_KEYS, TOPK, DIM_HEAD = 4, 128, 8, 256
    D2 = DIM_HEAD // 2
    DIM_QUERY = HEADS * DIM_HEAD

    key = jax.random.PRNGKey(0)
    kx, kw, kk, kv = jax.random.split(key, 4)
    x = jax.random.normal(kx, (B, T, DIM), jnp.float32)
    params = {
        # nn.Linear(dim, dim_query, bias=False) weight (stored transposed)
        "wq": jax.random.normal(kw, (DIM, DIM_QUERY), jnp.float32) / math.sqrt(DIM),
        # keys: (heads, num_keys, 2, dim_head//2), std = 1/sqrt(dim_head//2)
        "keys": jax.random.normal(kk, (HEADS, NUM_KEYS, 2, D2), jnp.float32) / math.sqrt(D2),
        # EmbeddingBag(num_keys**2, dim) weight, std = 1/sqrt(dim)
        "values": jax.random.normal(kv, (NUM_KEYS ** 2, DIM), jnp.float32) / math.sqrt(DIM),
    }

    # TODO(synk): input/query/value dropout (p=0.0 defaults) and the masked
    # path of MaskedBatchNorm (input_mask=None) are identity here.
    out = pkm_forward(x, params, heads=HEADS, num_keys=NUM_KEYS,
                      topk=TOPK, dim_head=DIM_HEAD)
    out = jax.block_until_ready(out)

    ref = pkm_reference(x, params, heads=HEADS, num_keys=NUM_KEYS,
                        topk=TOPK, dim_head=DIM_HEAD)
    assert out.shape == (B, T, DIM)
    err = float(jnp.max(jnp.abs(out - ref)))
    assert jnp.allclose(out, ref, atol=1e-3, rtol=1e-3), err
    print("KERNEL_OK")
</pallas_src>

<mosaic_0001>
module attributes {stable_mosaic.version = 11 : i64} {
  func.func @_qproj_kernel(%arg0: i32, %arg1: i32, %arg2: memref<16x128xbf16, #tpu.memory_space<vmem>>, %arg3: memref<128x512xbf16, #tpu.memory_space<vmem>>, %arg4: memref<16x512xbf16, #tpu.memory_space<vmem>>, %arg5: memref<1x512xf32, #tpu.memory_space<vmem>>, %arg6: memref<1x512xf32, #tpu.memory_space<vmem>>) attributes {dimension_semantics = [#tpu.dimension_semantics<parallel>, #tpu.dimension_semantics<arbitrary>], iteration_bounds = array<i64: 2, 1>, scalar_prefetch = 0 : i64, scratch_operands = 0 : i64, tpu.core_type = #tpu.core_type<tc>, window_params = [{transform_indices = @transform_0, window_bounds = array<i64: 16, 128>}, {transform_indices = @transform_1, window_bounds = array<i64: 128, 512>}, {transform_indices = @transform_2, window_bounds = array<i64: 16, 512>}, {transform_indices = @transform_3, window_bounds = array<i64: 1, 512>}, {transform_indices = @transform_4, window_bounds = array<i64: 1, 512>}]} {
    %c0 = arith.constant 0 : index
    %c0_0 = arith.constant 0 : index
    %0 = vector.load %arg2[%c0, %c0_0] : memref<16x128xbf16, #tpu.memory_space<vmem>>, vector<16x128xbf16>
    %c0_1 = arith.constant 0 : index
    %c0_2 = arith.constant 0 : index
    %1 = vector.load %arg3[%c0_1, %c0_2] : memref<128x512xbf16, #tpu.memory_space<vmem>>, vector<128x512xbf16>
    %cst = arith.constant dense<0.000000e+00> : vector<16x512xf32>
    %2 = tpu.matmul %0, %1, %cst {dimension_numbers = #tpu.dot_dimension_numbers<[1], [0], [0], [1], [0, 0, 1, 1], [], []>} : vector<16x128xbf16>, vector<128x512xbf16>, vector<16x512xf32> -> vector<16x512xf32>
    %3 = arith.truncf %2 : vector<16x512xf32> to vector<16x512xbf16>
    %c0_3 = arith.constant 0 : index
    %c0_4 = arith.constant 0 : index
    %4 = vector.load %arg4[%c0_3, %c0_4] : memref<16x512xbf16, #tpu.memory_space<vmem>>, vector<16x512xbf16>
    tpu.vector_store %arg4[%c0_3, %c0_4], %3 {strides = array<i32>} : memref<16x512xbf16, #tpu.memory_space<vmem>>, vector<16x512xbf16>,
    %c0_i32 = arith.constant 0 : i32
    %5 = arith.cmpi eq, %arg1, %c0_i32 : i32
    %6 = arith.extui %5 : i1 to i32
    %c0_i32_5 = arith.constant 0 : i32
    %7 = arith.cmpi ne, %6, %c0_i32_5 : i32
    scf.if %7 {
      %cst_16 = arith.constant 0.000000e+00 : f32
      %19 = vector.broadcast %cst_16 : f32 to vector<1x512xf32>
      %c0_17 = arith.constant 0 : index
      %c0_18 = arith.constant 0 : index
      %20 = vector.load %arg5[%c0_17, %c0_18] : memref<1x512xf32, #tpu.memory_space<vmem>>, vector<1x512xf32>
      tpu.vector_store %arg5[%c0_17, %c0_18], %19 {strides = array<i32>} : memref<1x512xf32, #tpu.memory_space<vmem>>, vector<1x512xf32>,
      %cst_19 = arith.constant 0.000000e+00 : f32
      %21 = vector.broadcast %cst_19 : f32 to vector<1x512xf32>
      %c0_20 = arith.constant 0 : index
      %c0_21 = arith.constant 0 : index
      %22 = vector.load %arg6[%c0_20, %c0_21] : memref<1x512xf32, #tpu.memory_space<vmem>>, vector<1x512xf32>
      tpu.vector_store %arg6[%c0_20, %c0_21], %21 {strides = array<i32>} : memref<1x512xf32, #tpu.memory_space<vmem>>, vector<1x512xf32>,
    } else {
    }
    %c0_6 = arith.constant 0 : index
    %c0_7 = arith.constant 0 : index
    %8 = vector.load %arg5[%c0_6, %c0_7] : memref<1x512xf32, #tpu.memory_space<vmem>>, vector<1x512xf32>
    %cst_8 = arith.constant dense<0.000000e+00> : vector<512xf32>
    %9 = vector.multi_reduction <add>, %2, %cst_8 [0] : vector<16x512xf32> to vector<512xf32>
    %10 = vector.shape_cast %9 : vector<512xf32> to vector<1x512xf32>
    %11 = arith.addf %8, %10 : vector<1x512xf32>
    %c0_9 = arith.constant 0 : index
    %c0_10 = arith.constant 0 : index
    %12 = vector.load %arg5[%c0_9, %c0_10] : memref<1x512xf32, #tpu.memory_space<vmem>>, vector<1x512xf32>
    tpu.vector_store %arg5[%c0_9, %c0_10], %11 {strides = array<i32>} : memref<1x512xf32, #tpu.memory_space<vmem>>, vector<1x512xf32>,
    %c0_11 = arith.constant 0 : index
    %c0_12 = arith.constant 0 : index
    %13 = vector.load %arg6[%c0_11, %c0_12] : memref<1x512xf32, #tpu.memory_space<vmem>>, vector<1x512xf32>
    %14 = arith.mulf %2, %2 : vector<16x512xf32>
    %cst_13 = arith.constant dense<0.000000e+00> : vector<512xf32>
    %15 = vector.multi_reduction <add>, %14, %cst_13 [0] : vector<16x512xf32> to vector<512xf32>
    %16 = vector.shape_cast %15 : vector<512xf32> to vector<1x512xf32>
    %17 = arith.addf %13, %16 : vector<1x512xf32>
    %c0_14 = arith.constant 0 : index
    %c0_15 = arith.constant 0 : index
    %18 = vector.load %arg6[%c0_14, %c0_15] : memref<1x512xf32, #tpu.memory_space<vmem>>, vector<1x512xf32>
    tpu.vector_store %arg6[%c0_14, %c0_15], %17 {strides = array<i32>} : memref<1x512xf32, #tpu.memory_space<vmem>>, vector<1x512xf32>,
    return
  }
  func.func @transform_0(%arg0: i32, %arg1: i32) -> (i32, i32) {
    %c0_i32 = arith.constant 0 : i32
    %c0_i32_0 = arith.constant 0 : i32
    return %arg1, %c0_i32 : i32, i32
  }
  func.func @transform_1(%arg0: i32, %arg1: i32) -> (i32, i32) {
    %c0_i32 = arith.constant 0 : i32
    %c0_i32_0 = arith.constant 0 : i32
    return %c0_i32, %arg0 : i32, i32
  }
  func.func @transform_2(%arg0: i32, %arg1: i32) -> (i32, i32) {
    %c0_i32 = arith.constant 0 : i32
    return %arg1, %arg0 : i32, i32
  }
  func.func @transform_3(%arg0: i32, %arg1: i32) -> (i32, i32) {
    %c0_i32 = arith.constant 0 : i32
    %c0_i32_0 = arith.constant 0 : i32
    return %c0_i32, %arg0 : i32, i32
  }
  func.func @transform_4(%arg0: i32, %arg1: i32) -> (i32, i32) {
    %c0_i32 = arith.constant 0 : i32
    %c0_i32_0 = arith.constant 0 : i32
    return %c0_i32, %arg0 : i32, i32
  }
}

</mosaic_0001>

<bundles_post_ra>
// kernel: tpu_custom_call.1
= control target key start
LH: loop header
LB: loop body
LE: loop exit
PB: predicated region body
PF: predicated region fallthrough
CT: control target
= control target key end

     0   :  { %10 = vsyncpa [#allocation3], 0  ;;  %s1711_s0 = inlined_call_operand.hbm [shape: bf16[16,128], index: 0, kind: input, shape index: {}]   ;;  %s1712_s1 = inlined_call_operand.hbm [shape: bf16[128,1024], index: 1, kind: input, shape index: {}]   ;;  %s1713_s2 = inlined_call_operand.hbm [shape: bf16[16,1024], index: 2, kind: output, shape index: {0}]   ;;  %s1714_s3 = inlined_call_operand.hbm [shape: f32[1,1024], index: 3, kind: output, shape index: {1}]   ;;  %s1715_s4 = inlined_call_operand.hbm [shape: f32[1,1024], index: 4, kind: output, shape index: {2}]  }
   0x1   :  { %11 = vsyncpa [#allocation6], 0 }
   0x2   :  { %13 = vsyncpa [#allocation6 + $0x1], 0 }
   0x3   :  { %14 = vsyncpa [#allocation4], 0 }
   0x4   :  { %16 = vsyncpa [#allocation4 + $0x1], 0 }
   0x5   :  { %17 = vsyncpa [#allocation9], 0 }
   0x6   :  { %19 = vsyncpa [#allocation9 + $0x1], 0  ;;  %s1398_s15 = smov 0   ;;  %s1400_s16 = smov 0  }
   0x7   :  { %s1402_s17 = smov 0   ;;  %s1404_s18 = smov 0  }
   0x8   :  { %s1406_s19 = smov 0   ;;  %s1408_s20 = smov 0  }
   0x9 LB: > { %1723 = sst [smem:[#allocation15_spill]] %s1335_s15  ;;  %s1429_s21 = sadd.s32 4294967295, %s1355_s20   ;;  %s1355_s20 = sphi %s1408_s20, %s25_s20   ;;  %s1351_s19 = sphi %s1406_s19, %s1748_s19   ;;  %s1347_s18 = sphi %s1404_s18, %s1747_s18   ;;  %s1343_s17 = sphi %s1402_s17, %s1746_s17   ;;  %s1339_s16 = sphi %s1400_s16, %s1745_s16   ;;  %s1335_s15 = sphi %s1398_s15, %s1744_s15  }
   0xa   : > { %1724 = sst [smem:[#allocation16_spill]] %s1355_s20  ;;  %s1718_s22 = sadd.s32 4294967294, %s1355_s20  }
   0xb   : > { %p77_p0 = scmp.ne.s32.totalorder %s1343_s17, %s1339_s16  ;;  %p78_p1 = scmp.eq.s32.totalorder %s1355_s20, 0 }
   0xc   : > { %p83_p2 = scmp.ne.s32.totalorder %s1339_s16, %s1335_s15  ;;  %p84_p3 = scmp.eq.s32.totalorder %s1429_s21, 0 }
   0xd   : > { %p1438_p4 = por %p78_p1, %p77_p0  ;;  %p109_p5 = scmp.eq.s32.totalorder %s1429_s21, 1 }
   0xe   : > { %p1445_p6 = por %p84_p3, %p83_p2  ;;  %p115_p7 = scmp.eq.s32.totalorder %s1718_s22, 1 }
   0xf   : > { %p1451_p8 = por %p109_p5, %p77_p0  ;;  %p950_p9 = scmp.ge.s32.totalorder %s1355_s20, 1 }
  0x10   : > { %s1726_s24 = scalar_select %p1445_p6, 1, 0 }
  0x11   : > { %s1727_s25 = scalar_select %p1451_p8, 1, 0 }
  0x12   : > { %p1456_p10 = por %p115_p7, %p83_p2  ;;  %p174_p11 = scmp.lt.s32.totalorder %s1355_s20, 3 }
  0x13   : > { %s1357_s28 = smov [#allocation2]   ;;  %p1049_p1 = scmp.lt.s32.totalorder %s1355_s20, 2 }
  0x14   : > { %s1728_s26 = scalar_select %p1456_p10, 1, 0 }
  0x15   : > { %p1461_p12 = pnand %p950_p9, %p174_p11  ;;  %s189_s29 = sshll.u32 %s1357_s28, 4  ;;  %s190_s29 = int_to_ptr.vmem [resolvable:$true] %s189_s29 }
  0x16   : > { %1729 = sst [smem:[#allocation17_spill]] %s1728_s26  ;;  %p1477_p2 = pnand %p1049_p1, %p1438_p4 }
  0x17   : > { %p1030_p13 = pneg %p1461_p12  ;;  %s37_s6 = sadd.s32 1, %s1351_s19 }
  0x18   : > { %s1172_s7 = scalar_lea.vmem %s190_s29, 128  ;;  %p1180_p0 = scmp.lt.s32.totalorder %s190_s29, %s190_s29 }
  0x19   : > { %p1471_p5 = pnand %p1030_p13, %p84_p3  ;;  %p1173_p9 = scmp.ne.s32.totalorder %s190_s29, %s1172_s7 }
  0x1a   : > { %p1181_p8 = scmp.lt.s32.totalorder %s1172_s7, %s1172_s7 }
  0x1b   : > { %p1163_p7 = pneg %p1471_p5 }
  0x1c   : > { %p1182_p6 = por %p1181_p8, %p1180_p0 }
  0x1d   : > { %p1175_p11 = pnand %p1173_p9, %p1163_p7 }
  0x1f   : > { %p1176_p10 = pneg %p1175_p11 }
  0x21   : > { %p1183_p13 = pnand %p1182_p6, %p1176_p10 }
  0x23   : > { %1186 = shalt.err (!%p1183_p13)
}
  0x24   : > { %s1358_s8 = smov 64   ;;  %s1359_s9 = smov 4  }
  0x25   : > { %1033 = dma.hbm_to_vmem [thread:$0]  (!%p1471_p5), %s1711_s0, 128, %s190_s29, [#allocation3], %s1358_s8, %s1358_s8, %s1359_s9  }
  0x26   : > { %p39_p4 = scmp.ge.s32.totalorder %s37_s6, 2  ;;  %s70_s12 = sadd.s32 1, %s1343_s17 }
  0x27   : > { %s203_s13 = sand.u32 1, %s1343_s17   ;;  %s1010_s28 = sshll.u32 %s1351_s19, 8 }
  0x28   : > { %s1750_s6 = smov (%p39_p4, %s37_s6), 0  ;;  %s953_s14 = sshll.u32 %s203_s13, 8 }
  0x29   : > { %s67_s23 = ssub.s32 %s1351_s19, %s1750_s6  ;;  %s213_s20 = scalar_lea.hbm %s1712_s1, %s1010_s28 }
  0x2a   : > { %p68_p6 = scmp.eq.s32.totalorder %s67_s23, 0  ;;  %s207_s30 = scalar_lea.vmem [#allocation5], %s953_s14 }
  0x2b   : > { %s214_s26 = sshll.u32 %s207_s30, 4  ;;  %s204_s29 = scalar_lea.sflag [#allocation6], %s203_s13  ;;  %s215_s26 = int_to_ptr.vmem [resolvable:$true] %s214_s26 }
  0x2c   : > { %s1500_s15 = scalar_select %p68_p6, %s1343_s17, %s70_s12  }
  0x2d   : > { %p1189_p8 = pneg %p1477_p2  ;;  %s1200_s8 = scalar_lea.vmem %s215_s26, 4096 }
  0x2e   : > { %p1201_p10 = scmp.ne.s32.totalorder %s215_s26, %s1200_s8  ;;  %s1360_s9 = smov [#allocation5]  }
  0x2f   : > { %s1205_s10 = sshll.u32 %s1360_s9, 4  ;;  %s1206_s10 = int_to_ptr.vmem [resolvable:$false] %s1205_s10 }
  0x30   : > { %p1203_p0 = pnand %p1201_p10, %p1189_p8  ;;  %s1207_s11 = scalar_lea.vmem %s1206_s10, 8192 }
  0x31   : > { %p1208_p5 = scmp.lt.s32.totalorder %s215_s26, %s1206_s10  ;;  %p1209_p7 = scmp.lt.s32.totalorder %s1207_s11, %s1200_s8 }
  0x32   : > { %p1204_p1 = pneg %p1203_p0 }
  0x33   : > { %p1210_p9 = por %p1209_p7, %p1208_p5 }
  0x35   : > { %p1211_p11 = pnand %p1210_p9, %p1204_p1 }
  0x37   : > { %1214 = shalt.err (!%p1211_p11)
}
  0x38   : > { %s1361_s22 = smov 512   ;;  %s1362_s12 = smov 256  }
  0x39   : > { %s1363_s14 = smov 16   ;;  %226 = sbr.rel (%p1461_p12) target bundleno = 373 (0x175), region = 28 }
  0x3a   : > { %1037 = dma.hbm_to_vmem [thread:$0]  (!%p1477_p2), %s213_s20, 4096, %s215_s26, %s204_s29, %s1361_s22, %s1362_s12, %s1363_s14  }
  0x3e   : > { %1318 = dma.done.wait (%p84_p3), [#allocation3], 128  }
  0x3f   : > { %1320 = vsyncadd (%p84_p3), [#allocation3], 4294967168  ;;  %s1513_s13 = sand.u32 1, %s1339_s16   ;;  %p1733_p2 = scmp.ne.s32.totalorder %s1726_s24, 0 }
  0x40   : > { %s958_s23 = sshll.u32 %s1513_s13, 8  ;;  %s233_s28 = scalar_lea.sflag [#allocation6], %s1513_s13 }
  0x41   : > { %s1517_s7 = scalar_lea.vmem [#allocation5], %s958_s23 }
  0x42   : > { %1322 = dma.done.wait (%p1733_p2), %s233_s28, 4096  }
  0x43   : > { %1324 = vsyncadd (%p1733_p2), %s233_s28, 4294963200  ;;  %v1364_v0 = vmov 0   ;;  %v1112_v1 = vld [vmem:[%s1517_s7 + $0xe4] ss:$16 sps:$4 sm:$0xff]   ;;  %v1114_v2 = vld [vmem:[%s1517_s7 + $0xec] ss:$16 sps:$4 sm:$0xff]   ;;  %v596_v34 = vlaneseq }
  0x44   : > { %510 = vmatprep.mubr.bf16.mxu0 %v1364_v0  ;;  %553 = vmatprep.mubr.bf16.mxu1 %v1364_v0  ;;  %v1116_v3 = vld [vmem:[%s1517_s7 + $0xe0] ss:$16 sps:$4 sm:$0xff]   ;;  %v1117_v4 = vld [vmem:[%s1517_s7 + $0xe8] ss:$16 sps:$4 sm:$0xff]   ;;  %v1118_v5 = vld [vmem:[%s1517_s7 + $0xc4] ss:$16 sps:$4 sm:$0xff]  }
  0x45   : > { %478 = vmatprep.subr.bf16.mxu0 %v1112_v1  ;;  %521 = vmatprep.subr.bf16.mxu1 %v1114_v2  ;;  %v1120_v6 = vld [vmem:[%s1517_s7 + $0xcc] ss:$16 sps:$4 sm:$0xff]   ;;  %v1122_v7 = vld [vmem:[%s1517_s7 + $0xc0] ss:$16 sps:$4 sm:$0xff]   ;;  %v1123_v8 = vld [vmem:[%s1517_s7 + $0xc8] ss:$16 sps:$4 sm:$0xff]  }
  0x46   : > { %479 = vmatpush1.bf16.msra.mxu0 %v1116_v3  ;;  %522 = vmatpush1.bf16.msra.mxu1 %v1117_v4  ;;  %v1124_v9 = vld [vmem:[%s1517_s7 + $0xa4] ss:$16 sps:$4 sm:$0xff]   ;;  %v1126_v10 = vld [vmem:[%s1517_s7 + $0xac] ss:$16 sps:$4 sm:$0xff]   ;;  %v1128_v11 = vld [vmem:[%s1517_s7 + $0xa0] ss:$16 sps:$4 sm:$0xff]  }
  0x47   : > { %480 = vmatprep.subr.bf16.mxu0 %v1118_v5  ;;  %523 = vmatprep.subr.bf16.mxu1 %v1120_v6  ;;  %v1129_v12 = vld [vmem:[%s1517_s7 + $0xa8] ss:$16 sps:$4 sm:$0xff]   ;;  %v1130_v13 = vld [vmem:[%s1517_s7 + $0x84] ss:$16 sps:$4 sm:$0xff]   ;;  %v1132_v14 = vld [vmem:[%s1517_s7 + $0x8c] ss:$16 sps:$4 sm:$0xff]  }
  0x48   : > { %v1134_v15 = vld [vmem:[%s1517_s7 + $0x80] ss:$16 sps:$4 sm:$0xff]   ;;  %v1135_v16 = vld [vmem:[%s1517_s7 + $0x88] ss:$16 sps:$4 sm:$0xff]   ;;  %v1136_v17 = vld [vmem:[%s1517_s7 + $0x64] ss:$16 sps:$4 sm:$0xff]  }
  0x49   : > { %v1138_v18 = vld [vmem:[%s1517_s7 + $0x6c] ss:$16 sps:$4 sm:$0xff]   ;;  %v1140_v19 = vld [vmem:[%s1517_s7 + $0x60] ss:$16 sps:$4 sm:$0xff]   ;;  %v1141_v20 = vld [vmem:[%s1517_s7 + $0x68] ss:$16 sps:$4 sm:$0xff]  }
  0x4a   : > { %481 = vmatpush1.bf16.msra.mxu0 %v1122_v7  ;;  %524 = vmatpush1.bf16.msra.mxu1 %v1123_v8  ;;  %v1142_v21 = vld [vmem:[%s1517_s7 + $0x44] ss:$16 sps:$4 sm:$0xff]   ;;  %v1144_v22 = vld [vmem:[%s1517_s7 + $0x4c] ss:$16 sps:$4 sm:$0xff]   ;;  %v1146_v23 = vld [vmem:[%s1517_s7 + $0x40] ss:$16 sps:$4 sm:$0xff]  }
  0x4b   : > { %482 = vmatprep.subr.bf16.mxu0 %v1124_v9  ;;  %525 = vmatprep.subr.bf16.mxu1 %v1126_v10  ;;  %v1147_v24 = vld [vmem:[%s1517_s7 + $0x48] ss:$16 sps:$4 sm:$0xff]   ;;  %v1148_v25 = vld [vmem:[%s1517_s7 + $0x24] ss:$16 sps:$4 sm:$0xff]   ;;  %v1150_v26 = vld [vmem:[%s1517_s7 + $0x2c] ss:$16 sps:$4 sm:$0xff]  }
  0x4c   : > { %v1152_v27 = vld [vmem:[%s1517_s7 + $0x20] ss:$16 sps:$4 sm:$0xff]   ;;  %v1153_v28 = vld [vmem:[%s1517_s7 + $0x28] ss:$16 sps:$4 sm:$0xff]   ;;  %v1154_v29 = vld [vmem:[%s1517_s7 + $0x4] ss:$16 sps:$4 sm:$0xff]  }
  0x4d   : > { %v1156_v30 = vld [vmem:[%s1517_s7 + $0xc] ss:$16 sps:$4 sm:$0xff]   ;;  %v1158_v31 = vld [vmem:[%s1517_s7] ss:$16 sps:$4 sm:$0xff]   ;;  %v1159_v32 = vld [vmem:[%s1517_s7 + $0x8] ss:$16 sps:$4 sm:$0xff]  }
  0x4e   : > { %483 = vmatpush1.bf16.msra.mxu0 %v1128_v11  ;;  %526 = vmatpush1.bf16.msra.mxu1 %v1129_v12  ;;  %v1160_v33 = vld [vmem:[#allocation2] sm:$0xff]   ;;  %s960_s20 = sshll.u32 %s1513_s13, 2  ;;  %vm1557_vm0 = vcmp.lt.s32.totalorder %v596_v34, 512  ;;  %v1365_v36 = vmov 0.0   ;;  %s959_s27 = sshll.u32 %s1513_s13, 5 }
  0x4f   : > { %484 = vmatprep.subr.bf16.mxu0 %v1130_v13  ;;  %527 = vmatprep.subr.bf16.mxu1 %v1132_v14  ;;  %s1561_s24 = scalar_lea.vmem [#allocation8], %s960_s20  ;;  %s1566_s26 = scalar_lea.vmem [#allocation10], %s960_s20  ;;  %v1366_v41 = vmov 1966171168  }
  0x50   : > { %600 = vst.msk [vmem:[%s1561_s24] sm:$0xf] %vm1557_vm0, %v1365_v36  ;;  %601 = vst.msk [vmem:[%s1566_s26] sm:$0xf] %vm1557_vm0, %v1365_v36  ;;  %v1572_v42 = vunpack.c.l.s4 %v1366_v41  ;;  %s1574_s5 = scalar_lea.vmem [#allocation7], %s959_s27  ;;  %s1015_s29 = sshll.u32 %s1347_s18, 8 }
  0x51   : > { %s761_s30 = sshll.u32 %s1574_s5, 4  ;;  %s1586_s10 = scalar_lea.hbm %s1713_s2, %s1015_s29  ;;  %s1580_s30 = int_to_ptr.vmem [resolvable:$true] %s761_s30 }
  0x52   : > { %485 = vmatpush1.bf16.msra.mxu0 %v1134_v15  ;;  %528 = vmatpush1.bf16.msra.mxu1 %v1135_v16  ;;  %v639_v56 = vunpack.c.0.s8 %v1572_v42  ;;  %s735_s11 = scalar_lea.sflag [#allocation4], %s1513_s13  ;;  %s1215_s22 = scalar_lea.vmem %s1580_s30, 512 }
  0x53   : > { %486 = vmatprep.subr.bf16.mxu0 %v1136_v17  ;;  %529 = vmatprep.subr.bf16.mxu1 %v1138_v18  ;;  %p1216_p3 = scmp.ne.s32.totalorder %s1580_s30, %s1215_s22  ;;  %p1736_p12 = scmp.ne.s32.totalorder %s1727_s25, 0 }
  0x54   : > { %s1367_s12 = smov [#allocation7]  }
  0x55   : > { %p1217_p13 = pnand %p1216_p3, %p1736_p12  ;;  %s1219_s14 = sshll.u32 %s1367_s12, 4  ;;  %s1220_s14 = int_to_ptr.vmem [resolvable:$false] %s1219_s14 }
  0x56   : > { %487 = vmatpush1.bf16.msra.mxu0 %v1140_v19  ;;  %530 = vmatpush1.bf16.msra.mxu1 %v1141_v20  ;;  %s1221_s23 = scalar_lea.vmem %s1220_s14, 1024  ;;  %p1222_p6 = scmp.lt.s32.totalorder %s1580_s30, %s1220_s14 }
  0x57   : > { %488 = vmatprep.subr.bf16.mxu0 %v1142_v21  ;;  %531 = vmatprep.subr.bf16.mxu1 %v1144_v22  ;;  %p1218_p4 = pneg %p1217_p13  ;;  %p1223_p8 = scmp.lt.s32.totalorder %s1221_s23, %s1215_s22 }
  0x59   : > { %p1224_p10 = por %p1223_p8, %p1222_p6 }
  0x5a   : > { %489 = vmatpush1.bf16.msra.mxu0 %v1146_v23  ;;  %532 = vmatpush1.bf16.msra.mxu1 %v1147_v24 }
  0x5b   : > { %490 = vmatprep.subr.bf16.mxu0 %v1148_v25  ;;  %533 = vmatprep.subr.bf16.mxu1 %v1150_v26  ;;  %p1225_p0 = pnand %p1224_p10, %p1218_p4 }
  0x5e   : > { %491 = vmatpush1.bf16.msra.mxu0 %v1152_v27  ;;  %534 = vmatpush1.bf16.msra.mxu1 %v1153_v28 }
  0x5f   : > { %492 = vmatprep.subr.bf16.mxu0 %v1154_v29  ;;  %535 = vmatprep.subr.bf16.mxu1 %v1156_v30 }
  0x62   : > { %493 = vmatpush1.bf16.msra.mxu0 %v1158_v31  ;;  %536 = vmatpush1.bf16.msra.mxu1 %v1159_v32 }
  0x65   : > { %511 = vmatmul.mubr.bf16.vlgmr.msra.gmra.mxu0 %v1160_v33  ;;  %554 = vmatmul.mubr.bf16.vlgmr.msra.gmra.mxu1 %v1160_v33 }
 0x125   : > { %v512_v37 = vpop.f32.mrf.mxu0  ;;  %v555_v38 = vpop.f32.mrf.mxu1 }
 0x126   : > { %v667_v45 = vmul.f32 %v512_v37, %v512_v37  ;;  %v669_v46 = vmul.f32 %v555_v38, %v555_v38 }
 0x127   : > { %v514_v39 = vpop.f32.mrf.mxu0  ;;  %v557_v40 = vpop.f32.mrf.mxu1 }
 0x128   : > { %v1011_v43 = vpack.c.bf16 %v514_v39, %v512_v37  ;;  %v1012_v44 = vpack.c.bf16 %v557_v40, %v555_v38  ;;  %v668_v53 = vmul.f32 %v514_v39, %v514_v39  ;;  %v670_v54 = vmul.f32 %v557_v40, %v557_v40 }
 0x129   : > { %v516_v47 = vpop.f32.mrf.mxu0  ;;  %v559_v48 = vpop.f32.mrf.mxu1 }
 0x12a   : > { %588 = vst [vmem:[%s1574_s5] sm:$0xff] %v1011_v43  ;;  %589 = vst [vmem:[%s1574_s5 + $0x8] sm:$0xff] %v1012_v44  ;;  %v603_v49 = vadd.f32 %v516_v47, %v512_v37  ;;  %v671_v50 = vmul.f32 %v516_v47, %v516_v47  ;;  %v617_v51 = vadd.f32 %v559_v48, %v555_v38 }
 0x12b   : > { %v673_v52 = vmul.f32 %v559_v48, %v559_v48  ;;  %v518_v55 = vpop.f32.mrf.mxu0  ;;  %v561_v57 = vpop.f32.mrf.mxu1 }
 0x12c   : > { %v604_v58 = vrot.slane %v603_v49, 4  ;;  %v675_v59 = vadd.f32 %v671_v50, %v667_v45  ;;  %v618_v60 = vrot.slane %v617_v51, 4  ;;  %v1013_v62 = vpack.c.bf16 %v518_v55, %v516_v47 }
 0x12d   : > { %v689_v61 = vadd.f32 %v673_v52, %v669_v46  ;;  %v610_v63 = vadd.f32 %v518_v55, %v514_v39  ;;  %v672_v0 = vmul.f32 %v518_v55, %v518_v55  ;;  %v1014_v1 = vpack.c.bf16 %v561_v57, %v559_v48 }
 0x12e   : > { %v605_v2 = vadd.f32 %v604_v58, %v603_v49  ;;  %v676_v3 = vrot.slane %v675_v59, 4  ;;  %v619_v4 = vadd.f32 %v618_v60, %v617_v51  ;;  %590 = vst [vmem:[%s1574_s5 + $0x10] sm:$0xff] %v1013_v62  ;;  %v624_v8 = vadd.f32 %v561_v57, %v557_v40 }
 0x12f   : > { %v690_v5 = vrot.slane %v689_v61, 4  ;;  %v611_v6 = vrot.slane %v610_v63, 4  ;;  %v682_v7 = vadd.f32 %v672_v0, %v668_v53  ;;  %591 = vst [vmem:[%s1574_s5 + $0x18] sm:$0xff] %v1014_v1  ;;  %v674_v9 = vmul.f32 %v561_v57, %v561_v57 }
 0x130   : > { %v606_v10 = vrot.slane %v605_v2, 2  ;;  %v677_v11 = vadd.f32 %v676_v3, %v675_v59  ;;  %v620_v12 = vrot.slane %v619_v4, 2 }
 0x131   : > { %v691_v13 = vadd.f32 %v690_v5, %v689_v61 }
 0x132   : > { %1228 = shalt.err (!%p1225_p0)
}
 0x133   : > { %s1229_s28 = scalar_lea.hbm %s1586_s10, 512  ;;  %s1233_s27 = scalar_lea.hbm %s1713_s2, 1024 }
 0x134   : > { %p1230_p1 = scmp.ne.s32.totalorder %s1586_s10, %s1229_s28  ;;  %p1234_p9 = scmp.lt.s32.totalorder %s1586_s10, %s1713_s2 }
 0x135   : > { %p1235_p11 = scmp.lt.s32.totalorder %s1233_s27, %s1229_s28 }
 0x136   : > { %p1231_p5 = pnand %p1230_p1, %p1736_p12 }
 0x137   : > { %p1236_p2 = por %p1235_p11, %p1234_p9 }
 0x138   : > { %p1232_p7 = pneg %p1231_p5 }
 0x13a   : > { %p1237_p3 = pnand %p1236_p2, %p1232_p7 }
 0x13c   : > { %1240 = shalt.err (!%p1237_p3)
}
 0x13d   : > { %s1368_s8 = smov 256   ;;  %s1369_s9 = smov 512   ;;  %v612_v14 = vadd.f32 %v611_v6, %v610_v63  ;;  %v683_v15 = vrot.slane %v682_v7, 4  ;;  %v625_v16 = vrot.slane %v624_v8, 4  ;;  %v696_v17 = vadd.f32 %v674_v9, %v670_v54  ;;  %v602_v0 = vld [vmem:[%s1561_s24] sm:$0xf] }
 0x13e   : > { %s1370_s22 = smov 16   ;;  %v607_v18 = vadd.f32 %v606_v10, %v605_v2  ;;  %v678_v19 = vrot.slane %v677_v11, 2  ;;  %v621_v20 = vadd.f32 %v620_v12, %v619_v4  ;;  %v692_v21 = vrot.slane %v691_v13, 2  ;;  %s739_s13 = sand.u32 1, %s1429_s21   ;;  %v666_v3 = vld [vmem:[%s1566_s26] sm:$0xf] }
 0x13f   : > { %1024 = dma.vmem_to_hbm [thread:$0]  (%p1736_p12), %s1580_s30, 512, %s1586_s10, %s735_s11, %s1368_s8, %s1369_s9, %s1370_s22   ;;  %v613_v22 = vrot.slane %v612_v14, 2  ;;  %v684_v23 = vadd.f32 %v683_v15, %v682_v7  ;;  %v626_v24 = vadd.f32 %v625_v16, %v624_v8  ;;  %v697_v25 = vrot.slane %v696_v17, 4 }
 0x140   : > { %v608_v26 = vrot.slane %v607_v18, 1  ;;  %v679_v27 = vadd.f32 %v678_v19, %v677_v11  ;;  %v693_v28 = vadd.f32 %v692_v21, %v691_v13  ;;  %v641_v29 = vshrl.u32 %v596_v34, 7  ;;  %s1016_s30 = sshll.u32 %s1347_s18, 6  ;;  %s778_s10 = sshll.u32 %s1561_s24, 4  ;;  %s1627_s10 = int_to_ptr.vmem [resolvable:$true] %s778_s10 }
 0x141   : > { %v614_v30 = vadd.f32 %v613_v22, %v612_v14  ;;  %v685_v31 = vrot.slane %v684_v23, 2  ;;  %v627_v32 = vrot.slane %v626_v24, 2  ;;  %v698_v33 = vadd.f32 %v697_v25, %v696_v17  ;;  %s792_s11 = sshll.u32 %s1566_s26, 4  ;;  %s1625_s23 = scalar_lea.hbm %s1714_s3, %s1016_s30  ;;  %s1637_s11 = int_to_ptr.vmem [resolvable:$true] %s792_s11 }
 0x142   : > { %v680_v36 = vrot.slane %v679_v27, 1  ;;  %v622_v37 = vrot.slane %v621_v20, 1  ;;  %v609_v43 = vadd.f32 %v608_v26, %v607_v18  ;;  %v694_v44 = vrot.slane %v693_v28, 1  ;;  %s1635_s28 = scalar_lea.hbm %s1715_s4, %s1016_s30  ;;  %s1639_s7 = scalar_lea.sflag [#allocation9], %s739_s13 }
 0x143   : > { %v615_v38 = vrot.slane %v614_v30, 1  ;;  %v686_v39 = vadd.f32 %v685_v31, %v684_v23  ;;  %v628_v40 = vadd.f32 %v627_v32, %v626_v24  ;;  %v699_v41 = vrot.slane %v698_v33, 2  ;;  %s1241_s20 = scalar_lea.vmem %s1627_s10, 64  ;;  %s1371_s27 = smov [#allocation8]  }
 0x144   : > { %v642_v45 = vsub.s32 %v639_v56, %v641_v29  ;;  %v681_v34 = vadd.f32 %v680_v36, %v679_v27  ;;  %v623_v50 = vadd.f32 %v622_v37, %v621_v20  ;;  %v695_v55 = vadd.f32 %v694_v44, %v693_v28  ;;  %p1242_p13 = scmp.ne.s32.totalorder %s1627_s10, %s1241_s20  ;;  %s1245_s5 = sshll.u32 %s1371_s27, 4  ;;  %s1246_s5 = int_to_ptr.vmem [resolvable:$false] %s1245_s5 }
 0x145   : > { %v616_v46 = vadd.f32 %v615_v38, %v614_v30  ;;  %v687_v47 = vrot.slane %v686_v39, 1  ;;  %v629_v48 = vrot.slane %v628_v40, 1  ;;  %v700_v49 = vadd.f32 %v699_v41, %v698_v33  ;;  %s1247_s29 = scalar_lea.vmem %s1246_s5, 128  ;;  %p1248_p8 = scmp.lt.s32.totalorder %s1627_s10, %s1246_s5 }
 0x146   : > { %p1243_p4 = pnand %p1242_p13, %p1736_p12  ;;  %p1249_p10 = scmp.lt.s32.totalorder %s1247_s29, %s1241_s20 }
 0x147   : > { %v635_v51 = vcombine.low %v609_v43, %v616_v46  ;;  %v688_v52 = vadd.f32 %v687_v47, %v686_v39  ;;  %v630_v53 = vadd.f32 %v629_v48, %v628_v40  ;;  %v701_v54 = vrot.slane %v700_v49, 1 }
 0x148   : > { %p1244_p6 = pneg %p1243_p4  ;;  %p1250_p0 = por %p1249_p10, %p1248_p8 }
 0x149   : > { %v643_v57 = vrot.slane %v635_v51, %v642_v45  ;;  %v707_v42 = vcombine.low %v681_v34, %v688_v52  ;;  %v636_v56 = vcombine.low %v623_v50, %v630_v53  ;;  %v702_v58 = vadd.f32 %v701_v54, %v700_v49 }
 0x14a   : > { %p1251_p1 = pnand %p1250_p0, %p1244_p6 }
 0x14b   : > { %v715_v59 = vrot.slane %v707_v42, %v642_v45  ;;  %v650_v60 = vrot.slane %v636_v56, %v642_v45  ;;  %v708_v61 = vcombine.low %v695_v55, %v702_v58 }
 0x14d   : > { %v651_v62 = vcombine.low %v643_v57, %v650_v60  ;;  %v722_v63 = vrot.slane %v708_v61, %v642_v45 }
 0x14f   : > { %v658_v1 = vrot.slane %v651_v62, %v642_v45  ;;  %v723_v2 = vcombine.low %v715_v59, %v722_v63 }
 0x151   : > { %v730_v4 = vrot.slane %v723_v2, %v642_v45  ;;  %v660_v5 = vadd.f32 %v658_v1, %v602_v0 }
 0x153   : > { %665 = vst.msk [vmem:[%s1561_s24] sm:$0xf] %vm1557_vm0, %v660_v5  ;;  %v732_v6 = vadd.f32 %v730_v4, %v666_v3 }
 0x154   : > { %1254 = shalt.err (!%p1251_p1)
}
 0x155   : > { %s1255_s24 = scalar_lea.hbm %s1625_s23, 64  ;;  %s1259_s22 = scalar_lea.hbm %s1714_s3, 128 }
 0x156   : > { %p1256_p5 = scmp.ne.s32.totalorder %s1625_s23, %s1255_s24  ;;  %p1260_p11 = scmp.lt.s32.totalorder %s1625_s23, %s1714_s3 }
 0x157   : > { %p1261_p2 = scmp.lt.s32.totalorder %s1259_s22, %s1255_s24 }
 0x158   : > { %p1257_p7 = pnand %p1256_p5, %p1736_p12 }
 0x159   : > { %p1262_p3 = por %p1261_p2, %p1260_p11 }
 0x15a   : > { %p1258_p9 = pneg %p1257_p7 }
 0x15c   : > { %p1263_p13 = pnand %p1262_p3, %p1258_p9 }
 0x15e   : > { %1266 = shalt.err (!%p1263_p13)
}
 0x15f   : > { %1025 = dma.vmem_to_hbm [thread:$0]  (%p1736_p12), %s1627_s10, 64, %s1625_s23, %s1639_s7   ;;  %733 = vst.msk [vmem:[%s1566_s26] sm:$0xf] %vm1557_vm0, %v732_v6 }
 0x160   : > { %s1267_s12 = scalar_lea.vmem %s1637_s11, 64  ;;  %s1372_s14 = smov [#allocation10]  }
 0x161   : > { %p1268_p4 = scmp.ne.s32.totalorder %s1637_s11, %s1267_s12  ;;  %s1271_s18 = sshll.u32 %s1372_s14, 4  ;;  %s1272_s18 = int_to_ptr.vmem [resolvable:$false] %s1271_s18 }
 0x162   : > { %s1273_s21 = scalar_lea.vmem %s1272_s18, 128  ;;  %p1274_p10 = scmp.lt.s32.totalorder %s1637_s11, %s1272_s18 }
 0x163   : > { %p1269_p6 = pnand %p1268_p4, %p1736_p12  ;;  %p1275_p0 = scmp.lt.s32.totalorder %s1273_s21, %s1267_s12 }
 0x165   : > { %p1270_p8 = pneg %p1269_p6  ;;  %p1276_p1 = por %p1275_p0, %p1274_p10 }
 0x167   : > { %p1277_p5 = pnand %p1276_p1, %p1270_p8 }
 0x169   : > { %1280 = shalt.err (!%p1277_p5)
}
 0x16a   : > { %s1281_s10 = scalar_lea.hbm %s1635_s28, 64  ;;  %s1285_s20 = scalar_lea.hbm %s1715_s4, 128 }
 0x16b   : > { %p1282_p7 = scmp.ne.s32.totalorder %s1635_s28, %s1281_s10  ;;  %p1286_p2 = scmp.lt.s32.totalorder %s1635_s28, %s1715_s4 }
 0x16c   : > { %p1287_p3 = scmp.lt.s32.totalorder %s1285_s20, %s1281_s10 }
 0x16d   : > { %p1283_p9 = pnand %p1282_p7, %p1736_p12 }
 0x16e   : > { %p1288_p13 = por %p1287_p3, %p1286_p2 }
 0x16f   : > { %p1284_p11 = pneg %p1283_p9 }
 0x171   : > { %p1289_p4 = pnand %p1288_p13, %p1284_p11 }
 0x173   : > { %1292 = shalt.err (!%p1289_p4)
}
 0x174   : > { %1026 = dma.vmem_to_hbm [thread:$0]  (%p1736_p12), %s1637_s11, 64, %s1635_s28, %s1639_s7  }
 0x175 PF: > { %s1737_s29 = sld [smem:[#allocation15_spill]] }
 0x176   : > { %s1738_s24 = sld [smem:[#allocation17_spill]] }
 0x177   : > { %s1739_s8 = sld [smem:[#allocation16_spill]] }
 0x17b   : > { %s804_s9 = sand.u32 1, %s1737_s29  }
 0x17c   : > { %p1740_p6 = scmp.ne.s32.totalorder %s1738_s24, 0  ;;  %s805_s22 = scalar_lea.sflag [#allocation4], %s804_s9 }
 0x17d   : > { %p1741_p8 = scmp.ge.s32.totalorder %s1739_s8, 2 }
 0x17f   : > { %p1039_p10 = pnand %p1741_p8, %p1740_p6 }
 0x181   : > { %p1040_p0 = pneg %p1039_p10 }
 0x183   : > { %1326 = dma.done.wait (%p1040_p0), %s805_s22, 512  }
 0x184   : > { %1328 = vsyncadd (%p1040_p0), %s805_s22, 4294966784  ;;  %s1742_s13 = sadd.s32 4294967294, %s1739_s8  }
 0x185   : > { %s813_s30 = sand.u32 1, %s1742_s13  }
 0x186   : > { %s814_s25 = scalar_lea.sflag [#allocation9], %s813_s30 }
 0x187   : > { %1330 = dma.done.wait (%p1040_p0), %s814_s25, 128  }
 0x188   : > { %1332 = vsyncadd (%p1040_p0), %s814_s25, 4294967168  ;;  %s25_s20 = sadd.s32 1, %s1739_s8   ;;  %s1743_s11 = smov %s1500_s15 }
 0x189   : > { %p22_p12 = scmp.ge.s32.totalorder %s25_s20, 4   ;;  %s1744_s15 = smov %s1339_s16 }
 0x18a   : > { %s1745_s16 = smov %s1343_s17  ;;  %s1746_s17 = smov %s1743_s11 }
 0x18b   : > { %s1747_s18 = smov %s1351_s19  ;;  %s1748_s19 = smov %s1750_s6 }
 0x18c   :  { %24 = sbr.rel (!%p22_p12) target bundleno = 9 (0x9), region = 115 }
 0x191   :  { %828 = vsyncpa [#allocation3], 1 }
 0x192   :  { %830 = vsyncpa [#allocation3 + $0x1], 1 }
 0x193   :  { %831 = vsyncpa [#allocation6], 1 }
 0x194   :  { %833 = vsyncpa [#allocation6 + $0x1], 1 }
 0x195   :  { %834 = vsyncpa [#allocation4], 1 }
 0x196   :  { %836 = vsyncpa [#allocation4 + $0x1], 1 }
 0x197   :  { %837 = vsyncpa [#allocation9], 1 }
 0x198   :  { %839 = vsyncpa [#allocation9 + $0x1], 1 }

</bundles_post_ra>
